<compile_context>
chip_gen: v7x
topology: tpu7x:2x2x1
jax: 0.10.0
libtpu: 0.0.40
codegen_flags: <defaults>
</compile_context>

<pallas_src>
import jax
import jax.numpy as jnp
from jax import lax
from jax.experimental import pallas as pl
from jax.experimental.pallas import tpu as pltpu


def _round_up(x, m):
    return ((x + m - 1) // m) * m


def _vmem_capacity_bytes():
    # ~128 MiB on v5e/v6e, 64 MiB per TensorCore on v7x.  Conservative fallback.
    try:
        info = pltpu.get_tpu_info()
        cap = getattr(info, "vmem_capacity_bytes", None)
        if cap:
            return int(cap)
    except Exception:
        pass
    return 64 * 1024 * 1024


def _pick_tile(n, tile_max):
    """Token tile (multiple of 8); shrink so the grid has >=2 steps (v7x megacore)."""
    t = min(tile_max, _round_up(n, 8))
    if _round_up(n, t) // t < 2 and t > 8:
        t = _round_up((t + 1) // 2, 8)
    n_pad = _round_up(n, t)
    return t, n_pad


# Keep the scalar-prefetched id array comfortably inside SMEM (1-D int32[N]
# pads to next_pow2(4N) bytes); larger problems are chunked in the wrapper.
_MAX_SMEM_IDS = 32768


# ---------------------------------------------------------------------------
# Path A: small table resident in VMEM, one-hot gather on the MXU.
# ---------------------------------------------------------------------------
def _onehot_gather_kernel(idx_ref, table_ref, o_ref):
    # idx_ref  : (T, 1) int32 token ids for this tile (VMEM)
    # table_ref: (V_pad, E) embedding table, resident in VMEM for all steps
    # o_ref    : (T, E) output tile
    t = o_ref.shape[0]
    v_pad = table_ref.shape[0]
    ids = idx_ref[...]                                             # (T, 1)
    iota = lax.broadcasted_iota(jnp.int32, (t, v_pad), 1)          # (T, V_pad)
    # One-hot built in the table dtype: exact for bf16 tables (0/1 weights),
    # and we never down-cast an f32 table.
    onehot = (ids == iota).astype(table_ref.dtype)                 # (T, V_pad)
    o_ref[...] = jnp.dot(
        onehot, table_ref[...], preferred_element_type=jnp.float32
    ).astype(o_ref.dtype)


def _onehot_gather(table, idx, token_tile, vmem_cap):
    V, E = table.shape                      # E already 128-aligned
    N = idx.shape[0]
    T, N_pad = _pick_tile(N, token_tile)
    V_pad = _round_up(V, 128)               # MXU/lane-aligned contraction dim

    idx_col = jnp.pad(idx, (0, N_pad - N)).reshape(N_pad, 1)   # pad with id 0
    table_p = jnp.pad(table, ((0, V_pad - V), (0, 0)))

    itemsize = table.dtype.itemsize
    need = (2 * V_pad * E * itemsize        # resident table (double-buffered)
            + 2 * T * E * itemsize          # output tile (double-buffered)
            + 2 * T * 4                     # id tile
            + T * V_pad * 4)                # one-hot intermediate
    limit = int(min(vmem_cap, need + (8 << 20)))

    return pl.pallas_call(
        _onehot_gather_kernel,
        out_shape=jax.ShapeDtypeStruct((N_pad, E), table.dtype),
        grid_spec=pltpu.PrefetchScalarGridSpec(
            num_scalar_prefetch=0,
            grid=(N_pad // T,),
            in_specs=[
                pl.BlockSpec((T, 1), lambda i: (i, 0)),      # token ids
                pl.BlockSpec((V_pad, E), lambda i: (0, 0)),  # resident table
            ],
            out_specs=pl.BlockSpec((T, E), lambda i: (i, 0)),
        ),
        compiler_params=pltpu.CompilerParams(
            dimension_semantics=("parallel",),
            vmem_limit_bytes=limit,
        ),
    )(idx_col, table_p)


# ---------------------------------------------------------------------------
# Path B: medium table resident in VMEM, dynamic row reads (O(T*E) per tile).
# ---------------------------------------------------------------------------
def _rowread_gather_kernel(idx_ref, table_ref, o_ref):
    # idx_ref  : (N_pad,) int32 token ids in SMEM (scalar prefetch)
    # table_ref: (V_pad, E) embedding table resident in VMEM
    # o_ref    : (T, E) output tile
    i = pl.program_id(0)
    t = o_ref.shape[0]

    def body(j, carry):
        row = idx_ref[i * t + j]
        o_ref[pl.ds(j, 1), :] = table_ref[pl.ds(row, 1), :]
        return carry

    lax.fori_loop(0, t, body, 0, unroll=8)


def _rowread_gather(table, idx, token_tile, vmem_cap):
    V, E = table.shape
    N = idx.shape[0]
    T, N_pad = _pick_tile(N, token_tile)
    V_pad = _round_up(V, 8)

    idx_pad = jnp.pad(idx, (0, N_pad - N))
    table_p = jnp.pad(table, ((0, V_pad - V), (0, 0)))

    itemsize = table.dtype.itemsize
    need = 2 * V_pad * E * itemsize + 2 * T * E * itemsize
    limit = int(min(vmem_cap, need + (8 << 20)))

    return pl.pallas_call(
        _rowread_gather_kernel,
        out_shape=jax.ShapeDtypeStruct((N_pad, E), table.dtype),
        grid_spec=pltpu.PrefetchScalarGridSpec(
            num_scalar_prefetch=1,                               # ids -> SMEM
            grid=(N_pad // T,),
            in_specs=[pl.BlockSpec((V_pad, E), lambda i, ids: (0, 0))],
            out_specs=pl.BlockSpec((T, E), lambda i, ids: (i, 0)),
        ),
        compiler_params=pltpu.CompilerParams(
            dimension_semantics=("parallel",),
            vmem_limit_bytes=limit,
        ),
    )(idx_pad, table_p)


# ---------------------------------------------------------------------------
# Path C: table left in HBM, batched row DMAs landing directly in o_ref.
# ---------------------------------------------------------------------------
def _hbm_gather_kernel(idx_ref, table_ref, o_ref, sems):
    # idx_ref  : (N_pad,) int32 token ids in SMEM (scalar prefetch)
    # table_ref: (V, E) embedding table left in HBM (memory_space=pl.ANY)
    # o_ref    : (T, E) output tile (VMEM) -- DMAs land here directly
    # sems     : (T,) DMA semaphores, one per in-flight row copy
    i = pl.program_id(0)
    t = o_ref.shape[0]

    def issue(j, carry):
        row = idx_ref[i * t + j]
        pltpu.make_async_copy(
            table_ref.at[pl.ds(row, 1), :],     # (1, E) row in HBM
            o_ref.at[pl.ds(j, 1), :],           # directly into output tile
            sems.at[j],
        ).start()
        return carry

    # Unrolled issue loop: keeps ~1 descriptor push/cycle instead of a
    # serialized scalar loop body per row; all T copies are in flight at once.
    lax.fori_loop(0, t, issue, 0, unroll=8)

    def drain(j, carry):
        # wait() only needs the semaphore + transfer size: use a fixed dummy
        # (1, E) descriptor so the drain loop does no SMEM reads/address math.
        pltpu.make_async_copy(
            table_ref.at[pl.ds(0, 1), :],
            o_ref.at[pl.ds(0, 1), :],
            sems.at[j],
        ).wait()
        return carry

    lax.fori_loop(0, t, drain, 0)
    # TODO(synk): cross-step prefetch (double-buffered landing area) would hide
    # row-DMA latency behind the previous tile's writeback; relying on the
    # pipeline's output double-buffering for now.


def _hbm_gather(table, idx, row_batch, vmem_cap):
    V, E = table.shape
    N = idx.shape[0]
    T, N_pad = _pick_tile(N, row_batch)
    idx_pad = jnp.pad(idx, (0, N_pad - N))

    itemsize = table.dtype.itemsize
    limit = int(min(vmem_cap, 2 * T * E * itemsize + (8 << 20)))

    return pl.pallas_call(
        _hbm_gather_kernel,
        out_shape=jax.ShapeDtypeStruct((N_pad, E), table.dtype),
        grid_spec=pltpu.PrefetchScalarGridSpec(
            num_scalar_prefetch=1,                               # ids -> SMEM
            grid=(N_pad // T,),
            in_specs=[pl.BlockSpec(memory_space=pl.ANY)],        # table in HBM
            out_specs=pl.BlockSpec((T, E), lambda i, ids: (i, 0)),
            scratch_shapes=[pltpu.SemaphoreType.DMA((T,))],
        ),
        compiler_params=pltpu.CompilerParams(
            dimension_semantics=("parallel",),
            vmem_limit_bytes=limit,
        ),
    )(idx_pad, table)


# ---------------------------------------------------------------------------
# Public wrapper.
# ---------------------------------------------------------------------------
def user_embedding(table, x, *, token_tile=None, row_batch=256,
                   onehot_max_rows=2048, max_resident_bytes=None):
    """Equivalent of nn.Embedding(user_size + 1, embed_size, padding_idx=0)(x).

    table: (V, E) embedding table; row 0 must be the all-zeros padding row.
    x    : integer index array of arbitrary shape, values in [0, V).
    Returns x.shape + (E,) in table.dtype.
    """
    V, E = table.shape
    idx = jnp.clip(x.reshape(-1).astype(jnp.int32), 0, V - 1)  # OOB insurance
    N = idx.shape[0]

    # Lane-dense outputs: pad embedding dim to a multiple of 128, slice after.
    E_pad = _round_up(E, 128)
    table_p = table if E_pad == E else jnp.pad(table, ((0, 0), (0, E_pad - E)))

    itemsize = table.dtype.itemsize
    vmem_cap = _vmem_capacity_bytes()
    if max_resident_bytes is None:
        # Double-buffered resident table must stay well inside VMEM:
        # ~16 MiB table on v5e/v6e (128 MiB VMEM), ~8 MiB on v7x (64 MiB).
        max_resident_bytes = vmem_cap // 8
    if token_tile is None:
        token_tile = 512 if vmem_cap >= (96 << 20) else 256

    V_pad_mxu = _round_up(V, 128)
    table_bytes = V * E_pad * itemsize

    if (V_pad_mxu <= onehot_max_rows
            and V_pad_mxu * E_pad * itemsize <= max_resident_bytes):
        out = _onehot_gather(table_p, idx, token_tile, vmem_cap)[:N]
    else:
        if table_bytes <= max_resident_bytes:
            run = lambda part: _rowread_gather(table_p, part, token_tile, vmem_cap)
        else:
            run = lambda part: _hbm_gather(table_p, part, row_batch, vmem_cap)
        # Chunk so the scalar-prefetched id array always fits SMEM.
        chunks = []
        for s in range(0, N, _MAX_SMEM_IDS):
            part = idx[s:s + _MAX_SMEM_IDS]
            chunks.append(run(part)[:part.shape[0]])
        out = chunks[0] if len(chunks) == 1 else jnp.concatenate(chunks, axis=0)

    if E_pad != E:
        out = out[:, :E]
    return out.reshape(x.shape + (E,))


def make_user_embedding_params(user_size, embed_size, key):
    """nn.Embedding-style init: N(0,1) with the padding_idx=0 row zeroed."""
    V = user_size + 1
    table = jax.random.normal(key, (V, embed_size), dtype=jnp.float32)
    return table.at[0].set(0.0)


if __name__ == "__main__":
    key = jax.random.PRNGKey(0)
    k_table, k_idx = jax.random.split(key)

    user_size = 10          # 10 real users -> table has 11 rows (row 0 = pad)
    embed_size = 128        # lane-aligned embedding dim
    B, S = 2, 8

    table = make_user_embedding_params(user_size, embed_size, k_table)

    x = jax.random.randint(k_idx, (B, S), 0, user_size + 1, dtype=jnp.int32)
    x = x.at[0, 0].set(0)
    x = x.at[1, 3].set(0)

    ref = table[x]

    # Path A (default for this size): resident one-hot MXU gather.
    out_a = jax.block_until_ready(user_embedding(table, x))
    assert out_a.shape == (B, S, embed_size)
    assert out_a.dtype == table.dtype
    assert jnp.allclose(out_a, ref, atol=1e-6, rtol=1e-6)
    assert float(jnp.max(jnp.abs(out_a[0, 0]))) == 0.0   # padding rows exact 0
    assert float(jnp.max(jnp.abs(out_a[1, 3]))) == 0.0

    # Path B: force the resident dynamic-row-read path and check it too.
    out_b = jax.block_until_ready(user_embedding(table, x, onehot_max_rows=0))
    assert jnp.array_equal(out_b, ref)

    # Path C: force the HBM row-DMA path and check it too.
    out_c = jax.block_until_ready(
        user_embedding(table, x, max_resident_bytes=0, row_batch=16))
    assert jnp.array_equal(out_c, ref)

    print("KERNEL_OK")
</pallas_src>

<mosaic_0001>
module attributes {stable_mosaic.version = 11 : i64} {
  func.func @_onehot_gather_kernel(%arg0: i32, %arg1: memref<8x1xi32, #tpu.memory_space<vmem>>, %arg2: memref<128x128xf32, #tpu.memory_space<vmem>>, %arg3: memref<8x128xf32, #tpu.memory_space<vmem>>) attributes {dimension_semantics = [#tpu.dimension_semantics<parallel>], iteration_bounds = array<i64: 2>, scalar_prefetch = 0 : i64, scratch_operands = 0 : i64, tpu.core_type = #tpu.core_type<tc>, window_params = [{transform_indices = @transform_0, window_bounds = array<i64: 8, 1>}, {pipeline_mode = #tpu.pipeline_mode<synchronous>, transform_indices = @transform_1, window_bounds = array<i64: 128, 128>}, {transform_indices = @transform_2, window_bounds = array<i64: 8, 128>}]} {
    %c0 = arith.constant 0 : index
    %c0_0 = arith.constant 0 : index
    %0 = vector.load %arg1[%c0, %c0_0] : memref<8x1xi32, #tpu.memory_space<vmem>>, vector<8x1xi32>
    %1 = tpu.iota {dimensions = array<i32: 1>} : vector<8x128xi32>
    %2 = vector.broadcast %0 : vector<8x1xi32> to vector<8x128xi32>
    %3 = arith.cmpi eq, %2, %1 : vector<8x128xi32>
    %4 = arith.extui %3 : vector<8x128xi1> to vector<8x128xi32>
    %5 = arith.sitofp %4 : vector<8x128xi32> to vector<8x128xf32>
    %c0_1 = arith.constant 0 : index
    %c0_2 = arith.constant 0 : index
    %6 = vector.load %arg2[%c0_1, %c0_2] : memref<128x128xf32, #tpu.memory_space<vmem>>, vector<128x128xf32>
    %cst = arith.constant dense<0.000000e+00> : vector<8x128xf32>
    %7 = tpu.matmul %5, %6, %cst {dimension_numbers = #tpu.dot_dimension_numbers<[1], [0], [0], [1], [0, 0, 1, 1], [], []>} : vector<8x128xf32>, vector<128x128xf32>, vector<8x128xf32> -> vector<8x128xf32>
    %c0_3 = arith.constant 0 : index
    %c0_4 = arith.constant 0 : index
    %8 = vector.load %arg3[%c0_3, %c0_4] : memref<8x128xf32, #tpu.memory_space<vmem>>, vector<8x128xf32>
    tpu.vector_store %arg3[%c0_3, %c0_4], %7 {strides = array<i32>} : memref<8x128xf32, #tpu.memory_space<vmem>>, vector<8x128xf32>,
    return
  }
  func.func @transform_0(%arg0: i32) -> (i32, i32) {
    %c0_i32 = arith.constant 0 : i32
    %c0_i32_0 = arith.constant 0 : i32
    return %arg0, %c0_i32 : i32, i32
  }
  func.func @transform_1(%arg0: i32) -> (i32, i32) {
    %c0_i32 = arith.constant 0 : i32
    %c0_i32_0 = arith.constant 0 : i32
    %c0_i32_1 = arith.constant 0 : i32
    return %c0_i32, %c0_i32_0 : i32, i32
  }
  func.func @transform_2(%arg0: i32) -> (i32, i32) {
    %c0_i32 = arith.constant 0 : i32
    %c0_i32_0 = arith.constant 0 : i32
    return %arg0, %c0_i32 : i32, i32
  }
}

</mosaic_0001>

<bundles_post_ra>
// kernel: tpu_custom_call.1
= control target key start
LH: loop header
LB: loop body
LE: loop exit
PB: predicated region body
PF: predicated region fallthrough
CT: control target
= control target key end

     0   :  { %7 = vsyncpa [#allocation3], 0  ;;  %s738_s0 = inlined_call_operand.vmem [shape: s32[16,1], index: 0, kind: input, shape index: {}]   ;;  %s739_s1 = inlined_call_operand.hbm [shape: f32[128,128], index: 1, kind: input, shape index: {}]   ;;  %s740_s2 = inlined_call_operand.hbm [shape: f32[16,128], index: 2, kind: output, shape index: {}]  }
   0x1   :  { %8 = vsyncpa [#allocation4], 0 }
   0x2   :  { %10 = vsyncpa [#allocation4 + $0x1], 0  ;;  %s603_s9 = smov 0   ;;  %s605_s10 = smov 0  }
   0x3   :  { %s607_s11 = smov 0   ;;  %s609_s12 = smov 0  }
   0x4 LB: > { %s624_s13 = sadd.s32 4294967295, %s577_s12   ;;  %s335_s14 = sadd.s32 4294967294, %s577_s12   ;;  %s577_s12 = sphi %s609_s12, %s756_s12   ;;  %s573_s11 = sphi %s607_s11, %s755_s11   ;;  %s569_s10 = sphi %s605_s10, %s754_s10   ;;  %s565_s9 = sphi %s603_s9, %s753_s9  }
   0x5   : > { %s628_s15 = sadd.s32 1, %s577_s12   ;;  %s70_s16 = sadd.s32 1, %s573_s11 }
   0x6   : > { %s67_s17 = ssub.s32 %s577_s12, %s628_s15  ;;  %p80_p0 = scmp.ne.s32.totalorder %s573_s11, %s569_s10 }
   0x7   : > { %p68_p1 = scmp.eq.s32.totalorder %s67_s17, 0  ;;  %p81_p2 = scmp.eq.s32.totalorder %s624_s13, 1 }
   0x8   : > { %p86_p3 = scmp.ne.s32.totalorder %s569_s10, %s565_s9  ;;  %p87_p4 = scmp.eq.s32.totalorder %s335_s14, 1 }
   0x9   : > { %s639_s18 = scalar_select %p68_p1, %s573_s11, %s70_s16  }
   0xa   : > { %p641_p5 = por %p81_p2, %p80_p0  ;;  %p645_p6 = por %p87_p4, %p86_p3 }
   0xb   : > { %p336_p7 = scmp.ge.s32.totalorder %s577_s12, 1  ;;  %p94_p8 = scmp.lt.s32.totalorder %s577_s12, 3 }
   0xc   : > { %s744_s19 = scalar_select %p641_p5, 1, 0 }
   0xd   : > { %s745_s20 = scalar_select %p645_p6, 1, 0 }
   0xe   : > { %p741_p9 = scmp.eq.s32.totalorder %s624_s13, 0  ;;  %p652_p10 = pnand %p336_p7, %p94_p8 }
   0xf   : > { %s579_s22 = smov [#allocation2]   ;;  %s483_s27 = scalar_lea.hbm %s739_s1, 2048 }
  0x10   : > { %s746_s21 = scalar_select %p652_p10, 1, 0 }
  0x11   : > { %s106_s23 = sshll.u32 %s579_s22, 4  ;;  %p431_p11 = pneg %p652_p10  ;;  %s107_s23 = int_to_ptr.vmem [resolvable:$true] %s106_s23 }
  0x12   : > { %p484_p13 = scmp.ne.s32.totalorder %s739_s1, %s483_s27  ;;  %p490_p3 = scmp.lt.u32.totalorder %s483_s27, %s739_s1 }
  0x13   : > { %p660_p12 = pnand %p741_p9, %p431_p11 }
  0x15   : > { %p485_p0 = pneg %p660_p12 }
  0x17   : > { %p486_p1 = pnand %p485_p0, %p484_p13 }
  0x19   : > { %p487_p2 = pneg %p486_p1 }
  0x1b   : > { %p492_p4 = pnand %p490_p3, %p487_p2 }
  0x1d   : > { %495 = shalt.err (!%p492_p4)
}
  0x1e   : > { %s496_s4 = scalar_lea.vmem %s107_s23, 2048  ;;  %p504_p9 = scmp.lt.s32.totalorder %s107_s23, %s107_s23 }
  0x1f   : > { %p497_p7 = scmp.ne.s32.totalorder %s107_s23, %s496_s4  ;;  %p505_p6 = scmp.lt.s32.totalorder %s496_s4, %s496_s4 }
  0x21   : > { %p499_p8 = pnand %p497_p7, %p485_p0  ;;  %p506_p5 = por %p505_p6, %p504_p9 }
  0x23   : > { %p500_p11 = pneg %p499_p8 }
  0x25   : > { %p507_p10 = pnand %p506_p5, %p500_p11 }
  0x27   : > { %510 = shalt.err (!%p507_p10)
}
  0x28   : > { %s580_s5 = smov 128   ;;  %s581_s6 = smov 8  }
  0x29   : > { %434 = dma.hbm_to_vmem [thread:$0]  (!%p660_p12), %s739_s1, 2048, %s107_s23, [#allocation3], %s580_s5, %s580_s5, %s581_s6  }
  0x2a   : > { %p748_p13 = scmp.ne.s32.totalorder %s746_s21, 0 }
  0x2b   : > { %p749_p1 = scmp.eq.s32.totalorder (!%p748_p13), %s624_s13, 0 }
  0x2c   : > { %129 = sbr.rel (%p748_p13) target bundleno = 414 (0x19e), region = 28 }
  0x33   : > { %556 = dma.done.wait (%p749_p1), [#allocation3], 2048   ;;  %p750_p0 = pmov %p749_p1 }
  0x34   : > { %p150_p5 = scmp.lt.s32.totalorder %s624_s13, 1  ;;  %v582_v0 = vmov 0   ;;  %v583_v1 = vmov 0.0|0.0   ;;  %v163_v3 = vld [vmem:[#allocation2] sm:$0xff]  ;;  %v164_v4 = vld [vmem:[#allocation2 + $0x8] sm:$0xff]  ;;  %v165_v6 = vld [vmem:[#allocation2 + $0x10] sm:$0xff]  ;;  %v155_v28 = vlaneseq }
  0x35   : > { %558 = vsyncadd (%p750_p0), [#allocation3], 4294965248  ;;  %482 = vset.pattern.permute.xlu0 %v582_v0  ;;  %401 = vmatprep.subr.bf16.mxu0 %v583_v1  ;;  %v402_v5 = vpack.c.bf16 %v164_v4, %v163_v3  ;;  %v166_v7 = vld [vmem:[#allocation2 + $0x18] sm:$0xff]  ;;  %vm584_vm0 = vmmov 0   ;;  %v585_v8 = vmov 0.0   ;;  %v167_v10 = vld [vmem:[#allocation2 + $0x20] sm:$0xff] }
  0x36   : > { %s151_s14 = scalar_select %p150_p5, %s624_s13, 1  ;;  %398 = vmatprep.mubr.msk.f32.mxu0 %vm584_vm0, %v585_v8  ;;  %v405_v9 = vpack.c.bf16 %v166_v7, %v165_v6  ;;  %v168_v11 = vld [vmem:[#allocation2 + $0x28] sm:$0xff]  ;;  %v169_v13 = vld [vmem:[#allocation2 + $0x30] sm:$0xff]  ;;  %v170_v14 = vld [vmem:[#allocation2 + $0x38] sm:$0xff]  ;;  %v156_v29 = vand.u32 127, %v155_v28  ;;  %v586_v31 = vmov 1.0  }
  0x37   : > { %403 = vmatpush3.bf16.msra.mxu0 %v402_v5  ;;  %v408_v12 = vpack.c.bf16 %v168_v11, %v167_v10  ;;  %v411_v15 = vpack.c.bf16 %v170_v14, %v169_v13  ;;  %v171_v16 = vld [vmem:[#allocation2 + $0x40] sm:$0xff]  ;;  %v172_v17 = vld [vmem:[#allocation2 + $0x48] sm:$0xff]  ;;  %v173_v19 = vld [vmem:[#allocation2 + $0x50] sm:$0xff]  ;;  %s147_s23 = sand.u32 1, %s569_s10   ;;  %s346_s27 = sshll.u32 %s624_s13, 7 }
  0x38   : > { %s342_s16 = sshll.u32 %s151_s14, 3  ;;  %404 = vmatprep.subr.bf16.mxu0 %v583_v1  ;;  %v414_v18 = vpack.c.bf16 %v172_v17, %v171_v16  ;;  %v174_v20 = vld [vmem:[#allocation2 + $0x58] sm:$0xff]  ;;  %v175_v22 = vld [vmem:[#allocation2 + $0x60] sm:$0xff]  ;;  %v176_v23 = vld [vmem:[#allocation2 + $0x68] sm:$0xff]  ;;  %s341_s24 = sshll.u32 %s147_s23, 3 }
  0x39   : > { %s153_s21 = scalar_lea.vmem %s738_s0, %s342_s16  ;;  %v417_v21 = vpack.c.bf16 %v174_v20, %v173_v19  ;;  %v420_v24 = vpack.c.bf16 %v176_v23, %v175_v22  ;;  %v177_v25 = vld [vmem:[#allocation2 + $0x70] sm:$0xff]  ;;  %v178_v26 = vld [vmem:[#allocation2 + $0x78] sm:$0xff]  ;;  %s149_s25 = scalar_lea.vmem [#allocation5], %s341_s24 }
  0x3a   : > { %v154_v2 = vld [vmem:[%s153_s21] sm:$0xff]  ;;  %v423_v27 = vpack.c.bf16 %v178_v26, %v177_v25  ;;  %s264_s26 = sshll.u32 %s149_s25, 4  ;;  %s698_s30 = scalar_lea.hbm %s740_s2, %s346_s27  ;;  %s693_s26 = int_to_ptr.vmem [resolvable:$true] %s264_s26 }
  0x3b   : > { %158 = vperm.xlu0 %482, %v154_v2   ;;  %406 = vmatpush3.bf16.msra.mxu0 %v405_v9  ;;  %s251_s3 = scalar_lea.sflag [#allocation4], %s147_s23  ;;  %s511_s4 = scalar_lea.vmem %s693_s26, 128 }
  0x3c   : > { %407 = vmatprep.subr.bf16.mxu0 %v583_v1  ;;  %p512_p6 = scmp.ne.s32.totalorder %s693_s26, %s511_s4  ;;  %p751_p9 = scmp.ne.s32.totalorder %s744_s19, 0 }
  0x3d   : > { %s587_s13 = smov [#allocation5]  }
  0x3e   : > { %p513_p10 = pnand %p512_p6, %p751_p9  ;;  %s515_s5 = sshll.u32 %s587_s13, 4  ;;  %s516_s5 = int_to_ptr.vmem [resolvable:$false] %s515_s5 }
  0x3f   : > { %409 = vmatpush3.bf16.msra.mxu0 %v408_v12  ;;  %s517_s6 = scalar_lea.vmem %s516_s5, 256  ;;  %p518_p2 = scmp.lt.s32.totalorder %s693_s26, %s516_s5 }
  0x40   : > { %410 = vmatprep.subr.bf16.mxu0 %v583_v1  ;;  %p514_p12 = pneg %p513_p10  ;;  %p519_p3 = scmp.lt.s32.totalorder %s517_s6, %s511_s4 }
  0x42   : > { %p520_p4 = por %p519_p3, %p518_p2 }
  0x43   : > { %412 = vmatpush3.bf16.msra.mxu0 %v411_v15 }
  0x44   : > { %413 = vmatprep.subr.bf16.mxu0 %v583_v1  ;;  %p521_p7 = pnand %p520_p4, %p514_p12 }
  0x47   : > { %415 = vmatpush3.bf16.msra.mxu0 %v414_v18 }
  0x48   : > { %416 = vmatprep.subr.bf16.mxu0 %v583_v1 }
  0x4b   : > { %418 = vmatpush3.bf16.msra.mxu0 %v417_v21 }
  0x4c   : > { %419 = vmatprep.subr.bf16.mxu0 %v583_v1 }
  0x4f   : > { %421 = vmatpush3.bf16.msra.mxu0 %v420_v24 }
  0x50   : > { %422 = vmatprep.subr.bf16.mxu0 %v583_v1 }
  0x53   : > { %424 = vmatpush3.bf16.msra.mxu0 %v423_v27 }
  0xba   : > { %v159_v30 = vpop.permute.xlu0 %158 }
  0xbb   : > { %vm160_vm1 = vcmp.eq.s32.totalorder %v159_v30, %v156_v29 }
  0xbc   : > { %399 = vmatmul.mubr.msk.f32.vlgmr.msra.gmra.mrb[0].mxu0 %vm160_vm1, %v586_v31 }
 0x18f   : > { %v245_v32 = vpop.f32.mrb[0].mxu0 }
 0x190   : > { %249 = vst [vmem:[%s149_s25] sm:$0xff] %v245_v32  ;;  %v400_v33 = vpop.f32.mrb[1].mxu0 }
 0x191   : > { %524 = shalt.err (!%p521_p7)
}
 0x192   : > { %s525_s7 = scalar_lea.hbm %s698_s30, 128  ;;  %s529_s16 = scalar_lea.hbm %s740_s2, 256 }
 0x193   : > { %p526_p8 = scmp.ne.s32.totalorder %s698_s30, %s525_s7  ;;  %p530_p1 = scmp.lt.u32.totalorder %s698_s30, %s740_s2 }
 0x194   : > { %p531_p0 = scmp.lt.u32.totalorder %s529_s16, %s525_s7  ;;  %p533_p6 = scmp.lt.u32.totalorder %s525_s7, %s698_s30 }
 0x195   : > { %p527_p11 = pnand %p526_p8, %p751_p9 }
 0x196   : > { %p532_p5 = por %p531_p0, %p530_p1 }
 0x197   : > { %p528_p13 = pneg %p527_p11 }
 0x198   : > { %p534_p10 = por %p533_p6, %p532_p5 }
 0x19a   : > { %p535_p12 = pnand %p534_p10, %p528_p13 }
 0x19c   : > { %538 = shalt.err (!%p535_p12)
}
 0x19d   : > { %429 = dma.vmem_to_hbm [thread:$0]  (%p751_p9), %s693_s26, 128, %s698_s30, %s251_s3  }
 0x19e PF: > { %p441_p2 = scmp.ge.s32.totalorder %s577_s12, 2  ;;  %s276_s21 = sand.u32 1, %s565_s9  }
 0x19f   : > { %p752_p3 = scmp.ne.s32.totalorder %s745_s20, 0  ;;  %s277_s23 = scalar_lea.sflag [#allocation4], %s276_s21 }
 0x1a1   : > { %p436_p4 = pnand %p441_p2, %p752_p3 }
 0x1a3   : > { %560 = dma.done.wait (!%p436_p4), %s277_s23, 128  }
 0x1a4   : > { %562 = vsyncadd (!%p436_p4), %s277_s23, 4294967168  ;;  %p13_p7 = scmp.ge.s32.totalorder %s628_s15, 4   ;;  %s753_s9 = smov %s569_s10 }
 0x1a5   : > { %s754_s10 = smov %s573_s11  ;;  %s755_s11 = smov %s639_s18 }
 0x1a6   : > { %s756_s12 = smov %s628_s15  ;;  %15 = sbr.rel (!%p13_p7) target bundleno = 4 (0x4), region = 68 }
 0x1ad   :  { %282 = vsyncpa [#allocation3], 1 }
 0x1ae   :  { %284 = vsyncpa [#allocation3 + $0x1], 1 }
 0x1af   :  { %285 = vsyncpa [#allocation4], 1 }
 0x1b0   :  { %287 = vsyncpa [#allocation4 + $0x1], 1 }

</bundles_post_ra>
